<compile_context>
chip_gen: v6e
topology: v6e:2x2x1
jax: 0.10.0
libtpu: 0.0.40
codegen_flags: <defaults>
</compile_context>

<pallas_src>
import jax
import jax.numpy as jnp
from jax.experimental import pallas as pl
from jax.experimental.pallas import tpu as pltpu


def critic_kernel(ht_ref, w_ref, b_ref, out_ref):
    """out = sigmoid(ht @ W^T + b) for the current (row-tile) block.

    ht_ref : (rows, input_size)            f32 (or bf16)
    w_ref  : (input_size, output_size)     f32 or bf16 (pre-transposed)
    b_ref  : (1, output_size)              f32
    out_ref: (rows, output_size)           f32
    """
    ht = ht_ref[...]
    w = w_ref[...]
    logits = (
        jnp.dot(ht.astype(w.dtype), w, preferred_element_type=jnp.float32)
        + b_ref[...]
    )
    out_ref[...] = jax.nn.sigmoid(logits).astype(out_ref.dtype)


def prepare_critic_params(w, b, param_dtype=jnp.float32):
    """One-time parameter prep (hoisted out of the per-call path).

    w: (output_size, input_size)  PyTorch nn.Linear layout
    b: (output_size,)
    Returns (w_t, bias) at their TRUE shapes (no lane padding):
      w_t : (input_size, output_size) in `param_dtype` (f32 or bf16)
      bias: (1, output_size)          f32 (bias/sigmoid epilogue stays f32)
    """
    output_size, _ = w.shape
    w_t = jnp.asarray(w, jnp.float32).T.astype(param_dtype)    # (in, out)
    bias = jnp.asarray(b, jnp.float32).reshape(1, output_size)  # (1, out)
    return w_t, bias


def critic_network_forward(ht, w_t, bias, *, row_tile=1024):
    """Pallas-backed CriticNetwork.forward.

    ht: (B, input_size)  -> (B, output_size) predicted rewards (f32).

    Small B: a single grid-less pallas_call with full-array VMEM blocks.
    Large B (a multiple of row_tile, e.g. the stacked T*B hidden states):
    a 1-D grid over row tiles, marked "parallel" for megacore sharding.
    """
    # .detach() in the PyTorch module only affects autograd; forward is identity.
    ht = jnp.asarray(ht)
    B, input_size = ht.shape
    in_w, output_size = w_t.shape
    assert in_w == input_size, "weight / input feature mismatch"

    # Advisory cost from LOGICAL (unpadded) sizes only.
    cost = pl.CostEstimate(
        flops=2 * B * input_size * output_size,
        transcendentals=B * output_size,                 # sigmoid -> exp on EUP
        bytes_accessed=(
            ht.dtype.itemsize * B * input_size           # ht
            + w_t.dtype.itemsize * input_size * output_size  # weight
            + bias.dtype.itemsize * output_size          # bias
            + 4 * B * output_size                        # f32 output
        ),
    )

    out_shape = jax.ShapeDtypeStruct((B, output_size), jnp.float32)

    if B <= row_tile or B % row_tile != 0:
        # Overhead-bound small case: one launch, everything resident in VMEM,
        # no padding, no wrapper-side reshaping.
        vmem = pl.BlockSpec(memory_space=pltpu.MemorySpace.VMEM)
        return pl.pallas_call(
            critic_kernel,
            out_shape=out_shape,
            in_specs=[vmem, vmem, vmem],
            out_specs=vmem,
            cost_estimate=cost,
        )(ht, w_t, bias)

    # Batched path: tile the row dimension; weight/bias blocks are the full
    # arrays (block index constant across the grid -> stay resident in VMEM).
    grid = (B // row_tile,)
    return pl.pallas_call(
        critic_kernel,
        out_shape=out_shape,
        grid=grid,
        in_specs=[
            pl.BlockSpec((row_tile, input_size), lambda i: (i, 0)),
            pl.BlockSpec((input_size, output_size), lambda i: (0, 0)),
            pl.BlockSpec((1, output_size), lambda i: (0, 0)),
        ],
        out_specs=pl.BlockSpec((row_tile, output_size), lambda i: (i, 0)),
        compiler_params=pltpu.CompilerParams(
            dimension_semantics=("parallel",)),      # v7x: shard rows over 2 TCs
        cost_estimate=cost,
    )(ht, w_t, bias)


def _reference_critic(ht, w, b):
    """Plain-JAX reference mirroring torch: sigmoid(ht @ W^T + b)."""
    return jax.nn.sigmoid(jnp.asarray(ht, jnp.float32) @ w.T + b)


if __name__ == "__main__":
    # Shapes consistent with CriticNetwork(input_size, output_size): ht is the
    # CoreNetwork hidden state (256 in the RAM paper), one baseline reward out.
    batch = 2
    input_size = 256
    output_size = 1

    key = jax.random.PRNGKey(0)
    kx, kw, kb, kx_big = jax.random.split(key, 4)

    # PyTorch-style U(-1/sqrt(fan_in), 1/sqrt(fan_in)) init.
    bound = 1.0 / (input_size ** 0.5)
    w = jax.random.uniform(kw, (output_size, input_size), jnp.float32, -bound, bound)
    b = jax.random.uniform(kb, (output_size,), jnp.float32, -bound, bound)
    ht = jax.random.normal(kx, (batch, input_size), jnp.float32)

    # One-time parameter prep (transpose only — no padding).
    w_t, bias = prepare_critic_params(w, b)

    # --- small / overhead-bound path (the module's nominal shape) ---
    out = critic_network_forward(ht, w_t, bias)
    jax.block_until_ready(out)
    out_ref = _reference_critic(ht, w, b)
    assert out.shape == (batch, output_size)
    assert jnp.allclose(out, out_ref, atol=1e-5, rtol=1e-5)

    # --- batched path (e.g. critic over all T*B glimpse hidden states) ---
    big_batch = 2048
    ht_big = jax.random.normal(kx_big, (big_batch, input_size), jnp.float32)
    out_big = critic_network_forward(ht_big, w_t, bias, row_tile=512)
    jax.block_until_ready(out_big)
    out_big_ref = _reference_critic(ht_big, w, b)
    assert out_big.shape == (big_batch, output_size)
    assert jnp.allclose(out_big, out_big_ref, atol=1e-5, rtol=1e-5)

    print("KERNEL_OK")
</pallas_src>

<mosaic_0001>
module attributes {stable_mosaic.version = 11 : i64} {
  func.func @critic_kernel(%arg0: memref<2x256xf32, #tpu.memory_space<vmem>>, %arg1: memref<256x1xf32, #tpu.memory_space<vmem>>, %arg2: memref<1x1xf32, #tpu.memory_space<vmem>>, %arg3: memref<2x1xf32, #tpu.memory_space<vmem>>) attributes {dimension_semantics = [], scalar_prefetch = 0 : i64, scratch_operands = 0 : i64, tpu.core_type = #tpu.core_type<tc>} {
    %c0 = arith.constant 0 : index
    %c0_0 = arith.constant 0 : index
    %0 = vector.load %arg0[%c0, %c0_0] : memref<2x256xf32, #tpu.memory_space<vmem>>, vector<2x256xf32>
    %c0_1 = arith.constant 0 : index
    %c0_2 = arith.constant 0 : index
    %1 = vector.load %arg1[%c0_1, %c0_2] : memref<256x1xf32, #tpu.memory_space<vmem>>, vector<256x1xf32>
    %cst = arith.constant dense<0.000000e+00> : vector<2x1xf32>
    %2 = tpu.matmul %0, %1, %cst {dimension_numbers = #tpu.dot_dimension_numbers<[1], [0], [0], [1], [0, 0, 1, 1], [], []>} : vector<2x256xf32>, vector<256x1xf32>, vector<2x1xf32> -> vector<2x1xf32>
    %c0_3 = arith.constant 0 : index
    %c0_4 = arith.constant 0 : index
    %3 = vector.load %arg2[%c0_3, %c0_4] : memref<1x1xf32, #tpu.memory_space<vmem>>, vector<1x1xf32>
    %4 = vector.broadcast %3 : vector<1x1xf32> to vector<2x1xf32>
    %5 = arith.addf %2, %4 : vector<2x1xf32>
    %6 = arith.negf %5 : vector<2x1xf32>
    %7 = math.exp %6 : vector<2x1xf32>
    %cst_5 = arith.constant 1.000000e+00 : f32
    %8 = vector.broadcast %cst_5 : f32 to vector<2x1xf32>
    %9 = arith.addf %8, %7 : vector<2x1xf32>
    %10 = arith.divf %8, %9 : vector<2x1xf32>
    %c0_6 = arith.constant 0 : index
    %c0_7 = arith.constant 0 : index
    %11 = vector.load %arg3[%c0_6, %c0_7] : memref<2x1xf32, #tpu.memory_space<vmem>>, vector<2x1xf32>
    tpu.vector_store %arg3[%c0_6, %c0_7], %10 {strides = array<i32>} : memref<2x1xf32, #tpu.memory_space<vmem>>, vector<2x1xf32>,
    return
  }
}

</mosaic_0001>

<bundles_post_ra>
// kernel: tpu_custom_call.1
= control target key start
LH: loop header
LB: loop body
LE: loop exit
PB: predicated region body
PF: predicated region fallthrough
CT: control target
= control target key end

     0   :  { %vm143_vm0 = vcmask 1024   ;;  %s316_s1 = inlined_call_operand.vmem [shape: f32[256,1], index: 1, kind: input, shape index: {}]   ;;  %s317_s0 = inlined_call_operand.vmem [shape: f32[2,256], index: 0, kind: input, shape index: {}]   ;;  %s318_s2 = inlined_call_operand.<no memory space> [shape: f32[1,1], index: 2, kind: input, shape index: {}]   ;;  %s319_s3 = inlined_call_operand.vmem [shape: f32[2,1], index: 3, kind: output, shape index: {}]  }
   0x1   :  { %v48_v0 = vld [vmem:[%s316_s1 + $0xf8] sm:$0xff]  ;;  %v47_v2 = vld [vmem:[%s316_s1 + $0xf0] sm:$0xff]  ;;  %v46_v4 = vld [vmem:[%s316_s1 + $0xe8] sm:$0xff]  ;;  %v8_v34 = vstv %s318_s2 }
   0x2   :  { %v32_v1 = vld [vmem:[%s316_s1 + $0x78] sm:$0xff]  ;;  %152 = vmatprep.subr.mxu0 %v48_v0  ;;  %v31_v3 = vld [vmem:[%s316_s1 + $0x70] sm:$0xff]  ;;  %v30_v5 = vld [vmem:[%s316_s1 + $0x68] sm:$0xff]  ;;  %9 = vst [vmem:[#allocation2] sm:$0x1] %v8_v34 }
   0x3   :  { %153 = vmatpush3.msra.mxu0 %v32_v1  ;;  %v45_v6 = vld [vmem:[%s316_s1 + $0xe0] sm:$0xff]  ;;  %v44_v8 = vld [vmem:[%s316_s1 + $0xd8] sm:$0xff]  ;;  %v43_v10 = vld [vmem:[%s316_s1 + $0xd0] sm:$0xff] }
   0x4   :  { %154 = vmatprep.subr.mxu0 %v47_v2  ;;  %v29_v7 = vld [vmem:[%s316_s1 + $0x60] sm:$0xff]  ;;  %v28_v9 = vld [vmem:[%s316_s1 + $0x58] sm:$0xff]  ;;  %v27_v11 = vld [vmem:[%s316_s1 + $0x50] sm:$0xff] }
   0x5   :  { %155 = vmatpush3.msra.mxu0 %v31_v3  ;;  %v42_v12 = vld [vmem:[%s316_s1 + $0xc8] sm:$0xff]  ;;  %v150_v13 = vld.sshfl [vmem:[%s317_s0] sm:$0x33 pattern:$0x76325410]  ;;  %v40_v18 = vld [vmem:[%s316_s1 + $0xb8] sm:$0xff] }
   0x6   :  { %156 = vmatprep.subr.mxu0 %v46_v4  ;;  %v26_v14 = vld [vmem:[%s316_s1 + $0x48] sm:$0xff]  ;;  %v64_v15 = vcombine.high %v150_v13, %v150_v13  ;;  %v41_v16 = vld [vmem:[%s316_s1 + $0xc0] sm:$0xff]  ;;  %v24_v19 = vld [vmem:[%s316_s1 + $0x38] sm:$0xff] }
   0x7   :  { %157 = vmatpush3.msra.mxu0 %v30_v5  ;;  %v25_v17 = vld [vmem:[%s316_s1 + $0x40] sm:$0xff]  ;;  %v39_v20 = vld [vmem:[%s316_s1 + $0xb0] sm:$0xff]  ;;  %v38_v22 = vld [vmem:[%s316_s1 + $0xa8] sm:$0xff] }
   0x8   :  { %158 = vmatprep.subr.mxu0 %v45_v6  ;;  %131 = vmatprep.mubr.f32.mxu0 %v64_v15  ;;  %v23_v21 = vld [vmem:[%s316_s1 + $0x30] sm:$0xff]  ;;  %v22_v23 = vld [vmem:[%s316_s1 + $0x28] sm:$0xff]  ;;  %v37_v24 = vld [vmem:[%s316_s1 + $0xa0] sm:$0xff] }
   0x9   :  { %159 = vmatpush3.msra.mxu0 %v29_v7  ;;  %v21_v25 = vld [vmem:[%s316_s1 + $0x20] sm:$0xff]  ;;  %v36_v26 = vld [vmem:[%s316_s1 + $0x98] sm:$0xff]  ;;  %v35_v28 = vld [vmem:[%s316_s1 + $0x90] sm:$0xff] }
   0xa   :  { %160 = vmatprep.subr.mxu0 %v44_v8  ;;  %v20_v27 = vld [vmem:[%s316_s1 + $0x18] sm:$0xff]  ;;  %v19_v29 = vld [vmem:[%s316_s1 + $0x10] sm:$0xff]  ;;  %v34_v30 = vld [vmem:[%s316_s1 + $0x88] sm:$0xff] }
   0xb   :  { %161 = vmatpush3.msra.mxu0 %v28_v9  ;;  %v18_v31 = vld [vmem:[%s316_s1 + $0x8] sm:$0xff]  ;;  %v33_v32 = vld [vmem:[%s316_s1 + $0x80] sm:$0xff] }
   0xc   :  { %162 = vmatprep.subr.mxu0 %v43_v10  ;;  %v17_v33 = vld [vmem:[%s316_s1] sm:$0xff] }
   0xd   :  { %163 = vmatpush3.msra.mxu0 %v27_v11  ;;  %v149_v36 = vld [vmem:[#allocation2] ss:$0 sm:$0xff] }
   0xe   :  { %164 = vmatprep.subr.mxu0 %v42_v12 }
   0xf   :  { %165 = vmatpush3.msra.mxu0 %v26_v14 }
  0x10   :  { %166 = vmatprep.subr.mxu0 %v41_v16 }
  0x11   :  { %167 = vmatpush3.msra.mxu0 %v25_v17 }
  0x12   :  { %168 = vmatprep.subr.mxu0 %v40_v18 }
  0x13   :  { %169 = vmatpush3.msra.mxu0 %v24_v19 }
  0x14   :  { %170 = vmatprep.subr.mxu0 %v39_v20 }
  0x15   :  { %171 = vmatpush3.msra.mxu0 %v23_v21 }
  0x16   :  { %172 = vmatprep.subr.mxu0 %v38_v22 }
  0x17   :  { %173 = vmatpush3.msra.mxu0 %v22_v23 }
  0x18   :  { %174 = vmatprep.subr.mxu0 %v37_v24 }
  0x19   :  { %175 = vmatpush3.msra.mxu0 %v21_v25 }
  0x1a   :  { %176 = vmatprep.subr.mxu0 %v36_v26 }
  0x1b   :  { %177 = vmatpush3.msra.mxu0 %v20_v27 }
  0x1c   :  { %178 = vmatprep.subr.mxu0 %v35_v28 }
  0x1d   :  { %179 = vmatpush3.msra.mxu0 %v19_v29 }
  0x1e   :  { %180 = vmatprep.subr.mxu0 %v34_v30 }
  0x1f   :  { %181 = vmatpush3.msra.mxu0 %v18_v31 }
  0x20   :  { %182 = vmatprep.subr.mxu0 %v33_v32 }
  0x21   :  { %183 = vmatpush3.msra.mxu0 %v17_v33 }
  0x22   :  { %132 = vmatmul.mubr.f32.vlgmr.msra.gmra.mxu0 %v150_v13 }
  0xe2   :  { %v184_v35 = vpop.f32.mrf.mxu0 }
  0xe4   :  { %v185_v37 = vpop.f32.mrf.mxu0 }
  0xe5   :  { %v186_v38 = vadd.f32 %v185_v37, %v184_v35 }
  0xe7   :  { %v134_v39 = vadd.f32 %v186_v38, %v149_v36 }
  0xe9   :  { %v151_v40 = vmul.f32 -1.442695, %v134_v39 }
  0xeb   :  { %187 = vpow2.f32 %v151_v40 }
  0xf8   :  { %v188_v41 = vpop.eup %187 }
  0xf9   :  { %v140_v42 = vadd.f32 1.0, %v188_v41 }
  0xfb   :  { %189 = vrcp.f32 %v140_v42 }
 0x108   :  { %v190_v43 = vpop.eup %189 }
 0x109   :  { %144 = vst.msk [vmem:[%s319_s3] sm:$0x3] %vm143_vm0, %v190_v43 }

</bundles_post_ra>
